<compile_context>
chip_gen: v7x
topology: tpu7x:2x2x1
jax: 0.10.0
libtpu: 0.0.40
codegen_flags: <defaults>
</compile_context>

<pallas_src>
import functools

import jax
import jax.numpy as jnp
import numpy as np
from jax.experimental import pallas as pl
from jax.experimental.pallas import tpu as pltpu

_BN_EPS = 1e-5
_LANE = 128


# ----------------------------------------------------------------------------
# Small helpers: padding / tile sizing / generation-aware budgets
# ----------------------------------------------------------------------------
def _round_up(x, m):
    return (x + m - 1) // m * m


def _pad2d(a, rows, cols):
    r, c = a.shape
    return jnp.pad(a, ((0, rows - r), (0, cols - c)))


@functools.lru_cache(maxsize=1)
def _gen_budget():
    """Returns (vmem_limit_bytes, max_row_tile), generation aware.
    v7x has 64 MiB VMEM per TensorCore -> smaller row tile + ~48 MiB limit;
    v5e/v6e (128 MiB) -> ~96 MiB limit and row tiles up to 2048."""
    vmem = 128 * 1024 * 1024
    try:
        get_info = getattr(pltpu, "get_tpu_info", None)
        if get_info is not None:
            info = get_info()
            vmem = int(getattr(info, "vmem_capacity_bytes", vmem))
    except Exception:
        pass
    if vmem <= 64 * 1024 * 1024:
        return 48 * 1024 * 1024, 512       # v7x
    return 96 * 1024 * 1024, 2048          # v5e / v6e


def _tile_m(m, tile_m):
    m8 = _round_up(m, 8)
    if m8 <= tile_m:
        return m8, m8          # (padded M, tile)
    return _round_up(m, tile_m), tile_m


def _tile_k(k, tile_k):
    kp = _round_up(k, _LANE)
    if kp <= tile_k:
        return kp, kp
    return _round_up(k, tile_k), tile_k


# ----------------------------------------------------------------------------
# Pallas kernel 1: tiled GEMM (MXU) with VMEM-resident weights, f32 scratch
# accumulator and per-M-tile BatchNorm partial statistics.
# Grid = (M tiles [parallel], K tiles [arbitrary/reduction]).
# ----------------------------------------------------------------------------
def _matmul_stats_kernel(x_ref, w_ref, y_ref, st_ref, acc_ref, *, tk):
    k = pl.program_id(1)

    @pl.when(k == 0)
    def _init():
        acc_ref[...] = jnp.zeros_like(acc_ref)

    # Weights stay VMEM-resident for the whole grid; slice the current K tile.
    k0 = pl.multiple_of(k * tk, _LANE)
    acc_ref[...] += jnp.dot(x_ref[...], w_ref[pl.ds(k0, tk), :],
                            preferred_element_type=jnp.float32)

    @pl.when(k == pl.num_programs(1) - 1)
    def _finalize():
        acc = acc_ref[...]                                   # f32 (tm, np_)
        s = jnp.sum(acc, axis=0, keepdims=True)              # (1, np_) channel sum
        ss = jnp.sum(acc * acc, axis=0, keepdims=True)       # (1, np_) channel sumsq
        st_ref[...] = jnp.concatenate([s, ss], axis=0)[None]
        y_ref[...] = acc.astype(y_ref.dtype)                 # emit in compute dtype


def matmul_stats(x2d, w2d, *, tm, tk, out_dtype, vmem_limit):
    """x2d: (Mp, Kp) compute dtype; w2d: (Kp, Np) compute dtype (VMEM-resident).
    Returns y (Mp, Np) out_dtype and per-M-tile stats (Mtiles, 2, Np) f32
    (row 0 = sum, row 1 = sum of squares), computed from the f32 accumulator."""
    mp, kp = x2d.shape
    np_ = w2d.shape[1]
    mt, kt = mp // tm, kp // tk
    return pl.pallas_call(
        functools.partial(_matmul_stats_kernel, tk=tk),
        out_shape=(jax.ShapeDtypeStruct((mp, np_), out_dtype),
                   jax.ShapeDtypeStruct((mt, 2, np_), jnp.float32)),
        grid_spec=pltpu.PrefetchScalarGridSpec(
            num_scalar_prefetch=0,
            grid=(mt, kt),
            in_specs=[pl.BlockSpec((tm, tk), lambda i, k: (i, k)),
                      # full weight, constant block index -> DMA'd once, stays in VMEM
                      pl.BlockSpec((kp, np_), lambda i, k: (0, 0))],
            out_specs=[pl.BlockSpec((tm, np_), lambda i, k: (i, 0)),
                       pl.BlockSpec((1, 2, np_), lambda i, k: (i, 0, 0))],
            scratch_shapes=[pltpu.VMEM((tm, np_), jnp.float32)]),
        compiler_params=pltpu.CompilerParams(
            dimension_semantics=("parallel", "arbitrary"),
            vmem_limit_bytes=vmem_limit),
    )(x2d, w2d)


# ----------------------------------------------------------------------------
# Pallas kernel 2: fused BN apply (precombined scale/shift FMA) + optional
# residual (itself scale/shifted, so the skip BN rides along) + optional ReLU.
# Grid = (M tiles [parallel],).
# ----------------------------------------------------------------------------
def _bn_apply_kernel(has_residual, apply_relu, *refs):
    if has_residual:
        y_ref, s_ref, b_ref, r_ref, rs_ref, rb_ref, o_ref = refs
    else:
        y_ref, s_ref, b_ref, o_ref = refs

    out = y_ref[...].astype(jnp.float32) * s_ref[...] + b_ref[...]
    if has_residual:
        out = out + r_ref[...].astype(jnp.float32) * rs_ref[...] + rb_ref[...]
    if apply_relu:
        out = jnp.maximum(out, 0.0)
    o_ref[...] = out.astype(o_ref.dtype)


def bn_apply(y, scale, shift, residual=None, res_scale=None, res_shift=None,
             relu=True, out_dtype=jnp.float32, *, tm, vmem_limit):
    mp, np_ = y.shape
    mt = mp // tm
    has_res = residual is not None

    row_spec = pl.BlockSpec((tm, np_), lambda i: (i, 0))
    vec_spec = pl.BlockSpec((1, np_), lambda i: (0, 0))      # resident per-channel vectors
    inputs = [y, scale, shift]
    in_specs = [row_spec, vec_spec, vec_spec]
    if has_res:
        inputs += [residual, res_scale, res_shift]
        in_specs += [row_spec, vec_spec, vec_spec]

    return pl.pallas_call(
        functools.partial(_bn_apply_kernel, has_res, relu),
        out_shape=jax.ShapeDtypeStruct((mp, np_), out_dtype),
        grid_spec=pltpu.PrefetchScalarGridSpec(
            num_scalar_prefetch=0,
            grid=(mt,),
            in_specs=in_specs,
            out_specs=row_spec),
        compiler_params=pltpu.CompilerParams(
            dimension_semantics=("parallel",),
            vmem_limit_bytes=vmem_limit),
    )(*inputs)


# ----------------------------------------------------------------------------
# Cross-tile stats reduction -> per-channel scale/shift (tiny, plain JAX).
# ----------------------------------------------------------------------------
def _bn_scale_shift(stats, gamma_p, beta_p, m_true):
    s = jnp.sum(stats[:, 0, :], axis=0)
    ss = jnp.sum(stats[:, 1, :], axis=0)
    mean = s / m_true
    var = jnp.maximum(ss / m_true - mean * mean, 0.0)   # biased batch variance
    scale = gamma_p * jax.lax.rsqrt(var + _BN_EPS)
    shift = beta_p - mean * scale
    return scale.reshape(1, -1), shift.reshape(1, -1)


# ----------------------------------------------------------------------------
# Layout glue: im2col for 3x3 / pad=1 convolutions (JAX slicing, no compute).
# Patches are materialized in compute_dtype (bf16 on the perf path).
# ----------------------------------------------------------------------------
def im2col_3x3(x_nhwc, stride):
    n, h, w, c = x_nhwc.shape
    ho = (h + 2 - 3) // stride + 1
    wo = (w + 2 - 3) // stride + 1
    xp = jnp.pad(x_nhwc, ((0, 0), (1, 1), (1, 1), (0, 0)))
    cols = []
    for kh in range(3):
        for kw in range(3):
            patch = jax.lax.slice(
                xp,
                (0, kh, kw, 0),
                (n, kh + (ho - 1) * stride + 1, kw + (wo - 1) * stride + 1, c),
                (1, stride, stride, 1),
            )  # (n, ho, wo, c)
            cols.append(patch)
    patches = jnp.concatenate(cols, axis=-1)   # k order: (kh*3+kw)*C + c
    return patches.reshape(n * ho * wo, 9 * c), (n, ho, wo)


def _w3x3_to_mat(w):  # torch (Cout, Cin, 3, 3) -> (9*Cin, Cout), matching im2col order
    return jnp.transpose(w, (2, 3, 1, 0)).reshape(-1, w.shape[0])


# ----------------------------------------------------------------------------
# BasicLayer forward (Pallas-backed)
# ----------------------------------------------------------------------------
def basic_layer_forward(x_nchw, params, halve_size, *,
                        compute_dtype=jnp.bfloat16, tile_m=None, tile_k=None):
    vmem_limit, tm_auto = _gen_budget()

    # TODO(synk): accept/return NHWC directly to drop the two boundary transposes.
    x = jnp.transpose(x_nchw, (0, 2, 3, 1)).astype(compute_dtype)   # NCHW -> NHWC
    n, h, w, cin = x.shape
    cout = params["conv1_w"].shape[0]
    stride1 = 2 if halve_size else 1
    ho = (h + 2 - 3) // stride1 + 1
    wo = (w + 2 - 3) // stride1 + 1
    m = n * ho * wo
    np_ = _round_up(cout, _LANE)   # lane-dense GEMM N dim

    tm_max = tile_m if tile_m is not None else tm_auto
    tk_max = tile_k if tile_k is not None else 512
    assert tm_max % 8 == 0 and tk_max % _LANE == 0
    mp, tm = _tile_m(m, tm_max)

    def padc(v):  # (cout,) -> (np_,) f32, zero padded
        return jnp.pad(v.astype(jnp.float32), (0, np_ - cout))

    mm = functools.partial(matmul_stats, tm=tm, out_dtype=compute_dtype,
                           vmem_limit=vmem_limit)
    bn = functools.partial(bn_apply, tm=tm, vmem_limit=vmem_limit)

    # ---- conv1 -> bn1 -> relu ------------------------------------------------
    p1, _ = im2col_3x3(x, stride1)                                  # (m, 9*cin)
    k1p, tk1 = _tile_k(9 * cin, tk_max)
    p1 = _pad2d(p1, mp, k1p)
    w1 = _pad2d(_w3x3_to_mat(params["conv1_w"]), k1p, np_).astype(compute_dtype)
    y1, st1 = mm(p1, w1, tk=tk1)
    sc1, sh1 = _bn_scale_shift(st1, padc(params["bn1_g"]), padc(params["bn1_b"]), m)
    out1 = bn(y1, sc1, sh1, relu=True, out_dtype=compute_dtype)

    # ---- residual path --------------------------------------------------------
    if halve_size:
        # 1x1 conv, stride 2, pad 0 == every-other-pixel GEMM; its BN apply is
        # deferred and fused into the final kernel via (res_scale, res_shift).
        xs = x[:, ::2, ::2, :].reshape(m, cin)
        ksp, tks = _tile_k(cin, tk_max)
        ps = _pad2d(xs, mp, ksp)
        ws = jnp.transpose(params["conv_skip_w"], (2, 3, 1, 0)).reshape(cin, cout)
        ws = _pad2d(ws, ksp, np_).astype(compute_dtype)
        r_y, st_s = mm(ps, ws, tk=tks)
        r_sc, r_sh = _bn_scale_shift(st_s, padc(params["bn_skip_g"]),
                                     padc(params["bn_skip_b"]), m)
    else:
        assert cin == cout and stride1 == 1, \
            "identity residual requires inC == outC and stride 1"
        r_y = _pad2d(x.reshape(m, cin), mp, np_)            # identity, compute_dtype
        r_sc = jnp.pad(jnp.ones((cout,), jnp.float32), (0, np_ - cout)).reshape(1, np_)
        r_sh = jnp.zeros((1, np_), jnp.float32)

    # ---- conv2 -> bn2 -> (+ residual w/ its BN) -> relu, apply fused ----------
    out1_nhwc = out1[:m, :cout].reshape(n, ho, wo, cout)
    p2, _ = im2col_3x3(out1_nhwc, 1)                                # (m, 9*cout)
    k2p, tk2 = _tile_k(9 * cout, tk_max)
    p2 = _pad2d(p2, mp, k2p)
    w2 = _pad2d(_w3x3_to_mat(params["conv2_w"]), k2p, np_).astype(compute_dtype)
    y2, st2 = mm(p2, w2, tk=tk2)
    sc2, sh2 = _bn_scale_shift(st2, padc(params["bn2_g"]), padc(params["bn2_b"]), m)
    out = bn(y2, sc2, sh2, residual=r_y, res_scale=r_sc, res_shift=r_sh,
             relu=True, out_dtype=jnp.float32)

    out = out[:m, :cout].reshape(n, ho, wo, cout)
    return jnp.transpose(out, (0, 3, 1, 2))                         # NHWC -> NCHW


# ----------------------------------------------------------------------------
# Pure-JAX reference (for correctness check only)
# ----------------------------------------------------------------------------
def basic_layer_ref(x_nchw, params, halve_size):
    x = jnp.transpose(x_nchw, (0, 2, 3, 1)).astype(jnp.float32)

    def conv(y, wt, stride, pad):
        return jax.lax.conv_general_dilated(
            y, jnp.transpose(wt, (2, 3, 1, 0)), (stride, stride),
            [(pad, pad), (pad, pad)], dimension_numbers=("NHWC", "HWIO", "NHWC"))

    def bn(y, g, b):
        mean = jnp.mean(y, axis=(0, 1, 2), keepdims=True)
        var = jnp.var(y, axis=(0, 1, 2), keepdims=True)
        return (y - mean) * jax.lax.rsqrt(var + _BN_EPS) * g + b

    s = 2 if halve_size else 1
    out = jax.nn.relu(bn(conv(x, params["conv1_w"], s, 1), params["bn1_g"], params["bn1_b"]))
    out = bn(conv(out, params["conv2_w"], 1, 1), params["bn2_g"], params["bn2_b"])
    if halve_size:
        res = bn(conv(x, params["conv_skip_w"], 2, 0),
                 params["bn_skip_g"], params["bn_skip_b"])
    else:
        res = x
    return jnp.transpose(jax.nn.relu(out + res), (0, 3, 1, 2))


# ----------------------------------------------------------------------------
# Deterministic parameter init (synthetic weights, shapes from __init__)
# ----------------------------------------------------------------------------
def init_params(key, inC, outC, halve_size):
    ks = jax.random.split(key, 8)
    params = {
        "conv1_w": 0.1 * jax.random.normal(ks[0], (outC, inC, 3, 3), jnp.float32),
        "bn1_g": 1.0 + 0.1 * jax.random.normal(ks[1], (outC,), jnp.float32),
        "bn1_b": 0.05 * jax.random.normal(ks[2], (outC,), jnp.float32),
        "conv2_w": 0.1 * jax.random.normal(ks[3], (outC, outC, 3, 3), jnp.float32),
        "bn2_g": 1.0 + 0.1 * jax.random.normal(ks[4], (outC,), jnp.float32),
        "bn2_b": 0.05 * jax.random.normal(ks[5], (outC,), jnp.float32),
    }
    if halve_size:
        params["conv_skip_w"] = 0.1 * jax.random.normal(ks[6], (outC, inC, 1, 1), jnp.float32)
        params["bn_skip_g"] = 1.0 + 0.1 * jax.random.normal(ks[7], (outC,), jnp.float32)
        params["bn_skip_b"] = jnp.zeros((outC,), jnp.float32)
    return params


if __name__ == "__main__":
    key = jax.random.PRNGKey(0)
    k1, k2, k3, kx1, kx2, kx3 = jax.random.split(key, 6)

    # Case 1: identity skip (inC == outC == 8), exercises a 4-tile M grid.
    params1 = init_params(k1, 8, 8, halve_size=False)
    x1 = jax.random.normal(kx1, (2, 8, 16, 16), jnp.float32)
    ref1 = basic_layer_ref(x1, params1, halve_size=False)
    out1_f32 = jax.block_until_ready(basic_layer_forward(
        x1, params1, halve_size=False, compute_dtype=jnp.float32, tile_m=128))
    assert out1_f32.shape == (2, 8, 16, 16)
    np.testing.assert_allclose(np.asarray(out1_f32), np.asarray(ref1), rtol=2e-4, atol=2e-4)
    # performance path: bf16 MXU inputs/intermediates, auto tiles (loose sanity check).
    out1_bf16 = jax.block_until_ready(basic_layer_forward(x1, params1, halve_size=False))
    np.testing.assert_allclose(np.asarray(out1_bf16), np.asarray(ref1), rtol=1e-1, atol=1e-1)

    # Case 2: halve_size=True (1x1 stride-2 conv skip), inC=4 -> outC=8.
    params2 = init_params(k2, 4, 8, halve_size=True)
    x2 = jax.random.normal(kx2, (2, 4, 16, 16), jnp.float32)
    ref2 = basic_layer_ref(x2, params2, halve_size=True)
    out2_f32 = jax.block_until_ready(basic_layer_forward(
        x2, params2, halve_size=True, compute_dtype=jnp.float32, tile_m=64))
    assert out2_f32.shape == (2, 8, 8, 8)
    np.testing.assert_allclose(np.asarray(out2_f32), np.asarray(ref2), rtol=2e-4, atol=2e-4)
    out2_bf16 = jax.block_until_ready(basic_layer_forward(x2, params2, halve_size=True))
    np.testing.assert_allclose(np.asarray(out2_bf16), np.asarray(ref2), rtol=1e-1, atol=1e-1)

    # Case 3: inC=outC=16 so 9*C=144 -> exercises the K reduction grid axis
    # (2 K tiles) against the VMEM-resident weight + in-kernel pl.ds slice.
    params3 = init_params(k3, 16, 16, halve_size=False)
    x3 = jax.random.normal(kx3, (2, 16, 8, 8), jnp.float32)
    ref3 = basic_layer_ref(x3, params3, halve_size=False)
    out3_f32 = jax.block_until_ready(basic_layer_forward(
        x3, params3, halve_size=False, compute_dtype=jnp.float32, tile_m=64, tile_k=128))
    assert out3_f32.shape == (2, 16, 8, 8)
    np.testing.assert_allclose(np.asarray(out3_f32), np.asarray(ref3), rtol=2e-4, atol=2e-4)

    print("KERNEL_OK")
</pallas_src>

<mosaic_0001>
module attributes {stable_mosaic.version = 11 : i64} {
  func.func @_matmul_stats_kernel(%arg0: i32, %arg1: i32, %arg2: memref<128x128xf32, #tpu.memory_space<vmem>>, %arg3: memref<128x128xf32, #tpu.memory_space<vmem>>, %arg4: memref<128x128xf32, #tpu.memory_space<vmem>>, %arg5: memref<1x2x128xf32, #tpu.memory_space<vmem>>, %arg6: memref<128x128xf32, #tpu.memory_space<vmem>>) attributes {dimension_semantics = [#tpu.dimension_semantics<parallel>, #tpu.dimension_semantics<arbitrary>], iteration_bounds = array<i64: 4, 1>, scalar_prefetch = 0 : i64, scratch_operands = 1 : i64, tpu.core_type = #tpu.core_type<tc>, window_params = [{transform_indices = @transform_0, window_bounds = array<i64: 128, 128>}, {pipeline_mode = #tpu.pipeline_mode<synchronous>, transform_indices = @transform_1, window_bounds = array<i64: 128, 128>}, {transform_indices = @transform_2, window_bounds = array<i64: 128, 128>}, {transform_indices = @transform_3, window_bounds = array<i64: 1, 2, 128>}]} {
    %c0_i32 = arith.constant 0 : i32
    %0 = arith.cmpi eq, %arg1, %c0_i32 : i32
    %1 = arith.extui %0 : i1 to i32
    %c0_i32_0 = arith.constant 0 : i32
    %2 = arith.cmpi ne, %1, %c0_i32_0 : i32
    scf.if %2 {
      %cst_9 = arith.constant 0.000000e+00 : f32
      %15 = vector.broadcast %cst_9 : f32 to vector<128x128xf32>
      %c0_10 = arith.constant 0 : index
      %c0_11 = arith.constant 0 : index
      %16 = vector.load %arg6[%c0_10, %c0_11] : memref<128x128xf32, #tpu.memory_space<vmem>>, vector<128x128xf32>
      tpu.vector_store %arg6[%c0_10, %c0_11], %15 {strides = array<i32>} : memref<128x128xf32, #tpu.memory_space<vmem>>, vector<128x128xf32>,
    } else {
    }
    %c128_i32 = arith.constant 128 : i32
    %3 = arith.muli %arg1, %c128_i32 : i32
    %4 = tpu.assume_multiple %3, 128 : i32
    %c0 = arith.constant 0 : index
    %c0_1 = arith.constant 0 : index
    %5 = vector.load %arg6[%c0, %c0_1] : memref<128x128xf32, #tpu.memory_space<vmem>>, vector<128x128xf32>
    %c0_2 = arith.constant 0 : index
    %c0_3 = arith.constant 0 : index
    %6 = vector.load %arg2[%c0_2, %c0_3] : memref<128x128xf32, #tpu.memory_space<vmem>>, vector<128x128xf32>
    %7 = arith.index_cast %4 : i32 to index
    %c0_4 = arith.constant 0 : index
    %8 = vector.load %arg3[%7, %c0_4] : memref<128x128xf32, #tpu.memory_space<vmem>>, vector<128x128xf32>
    %cst = arith.constant dense<0.000000e+00> : vector<128x128xf32>
    %9 = tpu.matmul %6, %8, %cst {dimension_numbers = #tpu.dot_dimension_numbers<[1], [0], [0], [1], [0, 0, 1, 1], [], []>} : vector<128x128xf32>, vector<128x128xf32>, vector<128x128xf32> -> vector<128x128xf32>
    %10 = arith.addf %5, %9 : vector<128x128xf32>
    %c0_5 = arith.constant 0 : index
    %c0_6 = arith.constant 0 : index
    %11 = vector.load %arg6[%c0_5, %c0_6] : memref<128x128xf32, #tpu.memory_space<vmem>>, vector<128x128xf32>
    tpu.vector_store %arg6[%c0_5, %c0_6], %10 {strides = array<i32>} : memref<128x128xf32, #tpu.memory_space<vmem>>, vector<128x128xf32>,
    %c0_i32_7 = arith.constant 0 : i32
    %12 = arith.cmpi eq, %arg1, %c0_i32_7 : i32
    %13 = arith.extui %12 : i1 to i32
    %c0_i32_8 = arith.constant 0 : i32
    %14 = arith.cmpi ne, %13, %c0_i32_8 : i32
    scf.if %14 {
      %c0_9 = arith.constant 0 : index
      %c0_10 = arith.constant 0 : index
      %15 = vector.load %arg6[%c0_9, %c0_10] : memref<128x128xf32, #tpu.memory_space<vmem>>, vector<128x128xf32>
      %cst_11 = arith.constant dense<0.000000e+00> : vector<128xf32>
      %16 = vector.multi_reduction <add>, %15, %cst_11 [0] : vector<128x128xf32> to vector<128xf32>
      %17 = vector.shape_cast %16 : vector<128xf32> to vector<1x128xf32>
      %18 = arith.mulf %15, %15 : vector<128x128xf32>
      %cst_12 = arith.constant dense<0.000000e+00> : vector<128xf32>
      %19 = vector.multi_reduction <add>, %18, %cst_12 [0] : vector<128x128xf32> to vector<128xf32>
      %20 = vector.shape_cast %19 : vector<128xf32> to vector<1x128xf32>
      %21 = tpu.concatenate %17, %20 in 0 : vector<1x128xf32>, vector<1x128xf32> -> vector<2x128xf32>
      %22 = vector.shape_cast %21 : vector<2x128xf32> to vector<1x2x128xf32>
      %c0_13 = arith.constant 0 : index
      %c0_14 = arith.constant 0 : index
      %c0_15 = arith.constant 0 : index
      %23 = vector.load %arg5[%c0_13, %c0_14, %c0_15] : memref<1x2x128xf32, #tpu.memory_space<vmem>>, vector<1x2x128xf32>
      tpu.vector_store %arg5[%c0_13, %c0_14, %c0_15], %22 {strides = array<i32>} : memref<1x2x128xf32, #tpu.memory_space<vmem>>, vector<1x2x128xf32>,
      %c0_16 = arith.constant 0 : index
      %c0_17 = arith.constant 0 : index
      %24 = vector.load %arg4[%c0_16, %c0_17] : memref<128x128xf32, #tpu.memory_space<vmem>>, vector<128x128xf32>
      tpu.vector_store %arg4[%c0_16, %c0_17], %15 {strides = array<i32>} : memref<128x128xf32, #tpu.memory_space<vmem>>, vector<128x128xf32>,
    } else {
    }
    return
  }
  func.func @transform_0(%arg0: i32, %arg1: i32) -> (i32, i32) {
    %c0_i32 = arith.constant 0 : i32
    return %arg0, %arg1 : i32, i32
  }
  func.func @transform_1(%arg0: i32, %arg1: i32) -> (i32, i32) {
    %c0_i32 = arith.constant 0 : i32
    %c0_i32_0 = arith.constant 0 : i32
    %c0_i32_1 = arith.constant 0 : i32
    return %c0_i32, %c0_i32_0 : i32, i32
  }
  func.func @transform_2(%arg0: i32, %arg1: i32) -> (i32, i32) {
    %c0_i32 = arith.constant 0 : i32
    %c0_i32_0 = arith.constant 0 : i32
    return %arg0, %c0_i32 : i32, i32
  }
  func.func @transform_3(%arg0: i32, %arg1: i32) -> (i32, i32, i32) {
    %c0_i32 = arith.constant 0 : i32
    %c0_i32_0 = arith.constant 0 : i32
    %c0_i32_1 = arith.constant 0 : i32
    return %arg0, %c0_i32, %c0_i32_0 : i32, i32, i32
  }
}

</mosaic_0001>

<bundles_post_ra>
// kernel: tpu_custom_call.1
= control target key start
LH: loop header
LB: loop body
LE: loop exit
PB: predicated region body
PF: predicated region fallthrough
CT: control target
= control target key end

     0   :  { %9 = vsyncpa [#allocation4], 0  ;;  %s1517_s0 = inlined_call_operand.hbm [shape: f32[512,128], index: 0, kind: input, shape index: {}]   ;;  %s1518_s1 = inlined_call_operand.hbm [shape: f32[128,128], index: 1, kind: input, shape index: {}]   ;;  %s1519_s2 = inlined_call_operand.hbm [shape: f32[512,128], index: 2, kind: output, shape index: {0}]   ;;  %s1520_s3 = inlined_call_operand.hbm [shape: f32[4,2,128], index: 3, kind: output, shape index: {1}]  }
   0x1   :  { %11 = vsyncpa [#allocation4 + $0x1], 0 }
   0x2   :  { %12 = vsyncpa [#allocation7], 0 }
   0x3   :  { %13 = vsyncpa [#allocation5], 0 }
   0x4   :  { %15 = vsyncpa [#allocation5 + $0x1], 0 }
   0x5   :  { %16 = vsyncpa [#allocation10], 0 }
   0x6   :  { %18 = vsyncpa [#allocation10 + $0x1], 0  ;;  %s1180_s12 = smov 0   ;;  %s1182_s13 = smov 0  }
   0x7   :  { %s1184_s14 = smov 0   ;;  %s1186_s15 = smov 0  }
   0x8   :  { %s1188_s16 = smov 0   ;;  %s1190_s17 = smov 0  }
   0x9 LB: > { %s734_s18 = sadd.s32 4294967295, %s1150_s17   ;;  %s735_s19 = sadd.s32 4294967294, %s1150_s17   ;;  %s1150_s17 = sphi %s1190_s17, %s24_s17   ;;  %s1146_s16 = sphi %s1188_s16, %s1543_s16   ;;  %s1142_s15 = sphi %s1186_s15, %s1542_s15   ;;  %s1138_s14 = sphi %s1184_s14, %s1541_s14   ;;  %s1134_s13 = sphi %s1182_s13, %s1540_s13   ;;  %s1130_s12 = sphi %s1180_s12, %s1539_s12  }
   0xa   : > { %p58_p0 = scmp.ne.s32.totalorder %s1134_s13, %s1130_s12  ;;  %p1214_p1 = scmp.eq.s32.totalorder %s734_s18, 0 }
   0xb   : > { %p1218_p2 = scmp.eq.s32.totalorder %s734_s18, 3  ;;  %p109_p3 = scmp.eq.s32.totalorder %s735_s19, 3 }
   0xc   : > { %s1525_s20 = scalar_select %p1214_p1, 1, 0 }
   0xd   : > { %s1526_s21 = scalar_select %p1218_p2, 1, 0 }
   0xe   : > { %p1224_p4 = por %p1214_p1, %p58_p0  ;;  %p736_p5 = scmp.ge.s32.totalorder %s1150_s17, 1 }
   0xf   : > { %p1229_p6 = por %p109_p3, %p58_p0  ;;  %p142_p7 = scmp.lt.s32.totalorder %s1150_s17, 5 }
  0x10   : > { %s1527_s22 = scalar_select %p1224_p4, 1, 0 }
  0x11   : > { %s1528_s23 = scalar_select %p1229_p6, 1, 0 }
  0x12   : > { %p1234_p8 = pnand %p736_p5, %p142_p7  ;;  %s1152_s25 = smov [#allocation6]  }
  0x13   : > { %s154_s26 = sshll.u32 %s1152_s25, 4  ;;  %s36_s28 = sadd.s32 1, %s1146_s16  ;;  %s155_s26 = int_to_ptr.vmem [resolvable:$true] %s154_s26 }
  0x14   : > { %s1529_s24 = scalar_select %p1234_p8, 1, 0 }
  0x15   : > { %p902_p9 = pneg %p1234_p8  ;;  %s974_s4 = scalar_lea.hbm %s1518_s1, 2048 }
  0x16   : > { %p975_p11 = scmp.ne.s32.totalorder %s1518_s1, %s974_s4  ;;  %p981_p3 = scmp.lt.u32.totalorder %s974_s4, %s1518_s1 }
  0x17   : > { %p1242_p10 = pnand %p902_p9, %p1214_p1 }
  0x19   : > { %p976_p12 = pneg %p1242_p10 }
  0x1b   : > { %p977_p13 = pnand %p976_p12, %p975_p11 }
  0x1d   : > { %p978_p0 = pneg %p977_p13 }
  0x1f   : > { %p983_p5 = pnand %p981_p3, %p978_p0 }
  0x21   : > { %986 = shalt.err (!%p983_p5)
}
  0x22   : > { %s987_s9 = scalar_lea.vmem %s155_s26, 2048  ;;  %p995_p1 = scmp.lt.s32.totalorder %s155_s26, %s155_s26 }
  0x23   : > { %p988_p7 = scmp.ne.s32.totalorder %s155_s26, %s987_s9  ;;  %p996_p4 = scmp.lt.s32.totalorder %s987_s9, %s987_s9 }
  0x25   : > { %p990_p9 = pnand %p988_p7, %p976_p12  ;;  %p997_p8 = por %p996_p4, %p995_p1 }
  0x27   : > { %p991_p6 = pneg %p990_p9 }
  0x29   : > { %p998_p2 = pnand %p997_p8, %p991_p6 }
  0x2b   : > { %1001 = shalt.err (!%p998_p2)
}
  0x2c   : > { %s1153_s10 = smov 128   ;;  %s1154_s11 = smov 8  }
  0x2d   : > { %905 = dma.hbm_to_vmem [thread:$0]  (!%p1242_p10), %s1518_s1, 2048, %s155_s26, [#allocation7], %s1153_s10, %s1153_s10, %s1154_s11  }
  0x2e   : > { %p38_p1 = scmp.ge.s32.totalorder %s36_s28, 4  ;;  %s45_s25 = sadd.s32 1, %s1138_s14 }
  0x2f   : > { %p52_p2 = scmp.ne.s32.totalorder %s1138_s14, %s1134_s13  ;;  %p53_p4 = scmp.eq.s32.totalorder %s1150_s17, 0 }
  0x30   : > { %s1545_s28 = smov (%p38_p1, %s36_s28), 0  ;;  %p1532_p8 = scmp.ne.s32.totalorder %s1526_s21, 0 }
  0x31   : > { %p1272_p6 = por %p53_p4, %p52_p2  ;;  %s40_s30 = ssub.s32 %s1146_s16, %s1545_s28 }
  0x32   : > { %p1278_p11 = por %p1532_p8, %p52_p2  ;;  %p918_p12 = scmp.lt.s32.totalorder %s1150_s17, 4 }
  0x33   : > { %p43_p10 = scmp.eq.s32.totalorder %s40_s30, 0  ;;  %s168_s26 = sand.u32 1, %s1138_s14  }
  0x34   : > { %s739_s4 = sshll.u32 %s168_s26, 7  ;;  %s754_s6 = sshll.u32 %s1146_s16, 11 }
  0x35   : > { %s1287_s5 = scalar_select %p43_p10, %s1138_s14, %s45_s25  }
  0x36   : > { %s1293_s9 = scalar_lea.hbm %s1517_s0, %s754_s6  ;;  %s172_s21 = scalar_lea.vmem [#allocation3], %s739_s4 }
  0x37   : > { %s180_s18 = sshll.u32 %s172_s21, 4  ;;  %p1299_p13 = pnand %p918_p12, %p1272_p6  ;;  %s1295_s18 = int_to_ptr.vmem [resolvable:$true] %s180_s18 }
  0x38   : > { %s1303_s25 = scalar_lea.sflag [#allocation4], %s168_s26  ;;  %s1002_s30 = scalar_lea.hbm %s1293_s9, 2048 }
  0x39   : > { %p1003_p0 = scmp.ne.s32.totalorder %s1293_s9, %s1002_s30  ;;  %p1004_p3 = pneg %p1299_p13 }
  0x3a   : > { %s1007_s29 = scalar_lea.hbm %s1517_s0, 8192  ;;  %p1008_p9 = scmp.lt.u32.totalorder %s1293_s9, %s1517_s0 }
  0x3b   : > { %p1005_p5 = pnand %p1004_p3, %p1003_p0  ;;  %p1009_p1 = scmp.lt.u32.totalorder %s1007_s29, %s1002_s30 }
  0x3c   : > { %p1011_p4 = scmp.lt.u32.totalorder %s1002_s30, %s1293_s9 }
  0x3d   : > { %p1006_p7 = pneg %p1005_p5  ;;  %p1010_p2 = por %p1009_p1, %p1008_p9 }
  0x3f   : > { %p1012_p6 = por %p1011_p4, %p1010_p2 }
  0x41   : > { %p1013_p8 = pnand %p1012_p6, %p1006_p7 }
  0x43   : > { %1016 = shalt.err (!%p1013_p8)
}
  0x44   : > { %s1017_s26 = scalar_lea.vmem %s1295_s18, 2048  ;;  %s1155_s21 = smov [#allocation3]  }
  0x45   : > { %p1018_p12 = scmp.ne.s32.totalorder %s1295_s18, %s1017_s26  ;;  %s1022_s4 = sshll.u32 %s1155_s21, 4  ;;  %s1023_s4 = int_to_ptr.vmem [resolvable:$false] %s1022_s4 }
  0x46   : > { %s1024_s6 = scalar_lea.vmem %s1023_s4, 4096  ;;  %p1025_p5 = scmp.lt.s32.totalorder %s1295_s18, %s1023_s4 }
  0x47   : > { %p1020_p10 = pnand %p1018_p12, %p1004_p3  ;;  %p1026_p9 = scmp.lt.s32.totalorder %s1024_s6, %s1017_s26 }
  0x49   : > { %p1021_p0 = pneg %p1020_p10  ;;  %p1027_p1 = por %p1026_p9, %p1025_p5 }
  0x4b   : > { %p1028_p2 = pnand %p1027_p1, %p1021_p0 }
  0x4d   : > { %1031 = shalt.err (!%p1028_p2)
}
  0x4e   : > { %909 = dma.hbm_to_vmem [thread:$0]  (!%p1299_p13), %s1293_s9, 2048, %s1295_s18, %s1303_s25, %s1153_s10, %s1153_s10, %s1154_s11  }
  0x4f   : > { %p1535_p3 = scmp.ne.s32.totalorder %s1529_s24, 0 }
  0x50   : > { %s1337_s30 = sand.u32 (!%p1535_p3), 1, %s1134_s13   ;;  %p1536_p7 = scmp.ne.s32.totalorder (!%p1535_p3), %s1527_s22, 0 }
  0x51   : > { %192 = sbr.rel (%p1535_p3) target bundleno = 412 (0x19c), region = 28  ;;  %s743_s29 = sshll.u32 (!%p1535_p3), %s1337_s30, 7 }
  0x52   : > { %s195_s7 = scalar_lea.sflag (!%p1535_p3), [#allocation4], %s1337_s30  ;;  %s1343_s19 = scalar_lea.vmem (!%p1535_p3), [#allocation3], %s743_s29 }
  0x58   : > { %1113 = dma.done.wait (%p1536_p7), %s195_s7, 2048  }
  0x59   : > { %1115 = vsyncadd (%p1536_p7), %s195_s7, 4294965248  ;;  %p1537_p13 = scmp.ne.s32.totalorder %s1525_s20, 0 }
  0x5b   : > { %1117 = dma.done.wait (%p1537_p13), [#allocation7], 2048  }
  0x5c   : > { %1119 = vsyncadd (%p1537_p13), [#allocation7], 4294965248  ;;  %v286_v0 = vld [vmem:[#allocation6] sm:$0xff]  ;;  %v287_v1 = vld [vmem:[#allocation6 + $0x8] sm:$0xff]  ;;  %s1373_s20 = scalar_lea.vmem [#allocation8], %s743_s29  ;;  %s755_s22 = sshll.u32 %s1142_s15, 11 }
  0x5d   : > { %v288_v2 = vld [vmem:[#allocation6 + $0x10] sm:$0xff]  ;;  %v844_v3 = vpack.c.bf16 %v287_v1, %v286_v0  ;;  %v289_v4 = vld [vmem:[#allocation6 + $0x18] sm:$0xff]  ;;  %v290_v6 = vld [vmem:[#allocation6 + $0x20] sm:$0xff]  ;;  %s594_s24 = sshll.u32 %s1373_s20, 4  ;;  %s1408_s9 = scalar_lea.hbm %s1519_s2, %s755_s22  ;;  %s1410_s24 = int_to_ptr.vmem [resolvable:$true] %s594_s24 }
  0x5e   : > { %v848_v5 = vpack.c.bf16 %v289_v4, %v288_v2  ;;  %v291_v7 = vld [vmem:[#allocation6 + $0x28] sm:$0xff]  ;;  %v269_v9 = vld [vmem:[%s1343_s19] sm:$0xff]  ;;  %v292_v10 = vld [vmem:[#allocation6 + $0x30] sm:$0xff]  ;;  %s576_s18 = scalar_lea.sflag [#allocation5], %s1337_s30  ;;  %s1032_s25 = scalar_lea.vmem %s1410_s24, 2048 }
  0x5f   : > { %845 = vmatprep.subr.bf16.mxu0 %v844_v3  ;;  %876 = vmatprep.subr.bf16.mxu1 %v844_v3  ;;  %v852_v8 = vpack.c.bf16 %v291_v7, %v290_v6  ;;  %v293_v11 = vld [vmem:[#allocation6 + $0x38] sm:$0xff]  ;;  %v277_v12 = vld [vmem:[%s1343_s19 + $0x40] sm:$0xff]  ;;  %v295_v15 = vld [vmem:[#allocation6 + $0x48] sm:$0xff]  ;;  %p1033_p4 = scmp.ne.s32.totalorder %s1410_s24, %s1032_s25  ;;  %s1156_s8 = smov [#allocation8]  }
  0x60   : > { %847 = vmatpush3.bf16.msra.mxu0 %v844_v3  ;;  %884 = vmatpush3.bf16.msra.mxu1 %v844_v3  ;;  %v856_v13 = vpack.c.bf16 %v293_v11, %v292_v10  ;;  %v294_v14 = vld [vmem:[#allocation6 + $0x40] sm:$0xff]  ;;  %v296_v17 = vld [vmem:[#allocation6 + $0x50] sm:$0xff]  ;;  %v297_v18 = vld [vmem:[#allocation6 + $0x58] sm:$0xff]  ;;  %s1036_s26 = sshll.u32 %s1156_s8, 4  ;;  %s1037_s26 = int_to_ptr.vmem [resolvable:$false] %s1036_s26 }
  0x61   : > { %849 = vmatprep.subr.bf16.mxu0 %v848_v5  ;;  %877 = vmatprep.subr.bf16.mxu1 %v848_v5  ;;  %v860_v16 = vpack.c.bf16 %v295_v15, %v294_v14  ;;  %v864_v19 = vpack.c.bf16 %v297_v18, %v296_v17  ;;  %v298_v20 = vld [vmem:[#allocation6 + $0x60] sm:$0xff]  ;;  %v299_v21 = vld [vmem:[#allocation6 + $0x68] sm:$0xff]  ;;  %v300_v23 = vld [vmem:[#allocation6 + $0x70] sm:$0xff]  ;;  %p1034_p6 = pnand %p1033_p4, %p1278_p11  ;;  %s1038_s21 = scalar_lea.vmem %s1037_s26, 4096 }
  0x62   : > { %820 = vmatprep.mubr.f32.mxu0 %v269_v9  ;;  %832 = vmatprep.mubr.f32.mxu1 %v277_v12  ;;  %v868_v22 = vpack.c.bf16 %v299_v21, %v298_v20  ;;  %v301_v24 = vld [vmem:[#allocation6 + $0x78] sm:$0xff]  ;;  %v270_v26 = vld [vmem:[%s1343_s19 + $0x8] sm:$0xff]  ;;  %v271_v28 = vld [vmem:[%s1343_s19 + $0x10] sm:$0xff]  ;;  %p1039_p12 = scmp.lt.s32.totalorder %s1410_s24, %s1037_s26  ;;  %p1040_p10 = scmp.lt.s32.totalorder %s1038_s21, %s1032_s25 }
  0x63   : > { %v872_v25 = vpack.c.bf16 %v301_v24, %v300_v23  ;;  %v278_v27 = vld [vmem:[%s1343_s19 + $0x48] sm:$0xff]  ;;  %v279_v29 = vld [vmem:[%s1343_s19 + $0x50] sm:$0xff]  ;;  %v272_v30 = vld [vmem:[%s1343_s19 + $0x18] sm:$0xff]  ;;  %p1035_p8 = pneg %p1034_p6 }
  0x64   : > { %851 = vmatpush3.bf16.msra.mxu0 %v848_v5  ;;  %885 = vmatpush3.bf16.msra.mxu1 %v848_v5  ;;  %v280_v31 = vld [vmem:[%s1343_s19 + $0x58] sm:$0xff]  ;;  %v273_v32 = vld [vmem:[%s1343_s19 + $0x20] sm:$0xff]  ;;  %v274_v34 = vld [vmem:[%s1343_s19 + $0x28] sm:$0xff]  ;;  %p1041_p0 = por %p1040_p10, %p1039_p12 }
  0x65   : > { %853 = vmatprep.subr.bf16.mxu0 %v852_v8  ;;  %878 = vmatprep.subr.bf16.mxu1 %v852_v8  ;;  %v281_v33 = vld [vmem:[%s1343_s19 + $0x60] sm:$0xff]  ;;  %v282_v35 = vld [vmem:[%s1343_s19 + $0x68] sm:$0xff]  ;;  %v275_v36 = vld [vmem:[%s1343_s19 + $0x30] sm:$0xff] }
  0x66   : > { %v283_v37 = vld [vmem:[%s1343_s19 + $0x70] sm:$0xff]  ;;  %v276_v38 = vld [vmem:[%s1343_s19 + $0x38] sm:$0xff]  ;;  %p1042_p5 = pnand %p1041_p0, %p1035_p8 }
  0x67   : > { %v284_v39 = vld [vmem:[%s1343_s19 + $0x78] sm:$0xff] }
  0x68   : > { %855 = vmatpush3.bf16.msra.mxu0 %v852_v8  ;;  %886 = vmatpush3.bf16.msra.mxu1 %v852_v8 }
  0x69   : > { %857 = vmatprep.subr.bf16.mxu0 %v856_v13  ;;  %879 = vmatprep.subr.bf16.mxu1 %v856_v13 }
  0x6c   : > { %859 = vmatpush3.bf16.msra.mxu0 %v856_v13  ;;  %887 = vmatpush3.bf16.msra.mxu1 %v856_v13 }
  0x6d   : > { %861 = vmatprep.subr.bf16.mxu0 %v860_v16  ;;  %880 = vmatprep.subr.bf16.mxu1 %v860_v16 }
  0x70   : > { %863 = vmatpush3.bf16.msra.mxu0 %v860_v16  ;;  %888 = vmatpush3.bf16.msra.mxu1 %v860_v16 }
  0x71   : > { %865 = vmatprep.subr.bf16.mxu0 %v864_v19  ;;  %881 = vmatprep.subr.bf16.mxu1 %v864_v19 }
  0x74   : > { %867 = vmatpush3.bf16.msra.mxu0 %v864_v19  ;;  %889 = vmatpush3.bf16.msra.mxu1 %v864_v19 }
  0x75   : > { %869 = vmatprep.subr.bf16.mxu0 %v868_v22  ;;  %882 = vmatprep.subr.bf16.mxu1 %v868_v22 }
  0x78   : > { %871 = vmatpush3.bf16.msra.mxu0 %v868_v22  ;;  %890 = vmatpush3.bf16.msra.mxu1 %v868_v22 }
  0x79   : > { %873 = vmatprep.subr.bf16.mxu0 %v872_v25  ;;  %883 = vmatprep.subr.bf16.mxu1 %v872_v25 }
  0x7c   : > { %875 = vmatpush3.bf16.msra.mxu0 %v872_v25  ;;  %891 = vmatpush3.bf16.msra.mxu1 %v872_v25 }
  0x7f   : > { %821 = vmatmul.mubr.f32.vlgmr.msra.gmra.mrb[0].mxu0 %v270_v26  ;;  %833 = vmatmul.mubr.f32.vlgmr.msra.gmra.mrb[0].mxu1 %v278_v27 }
  0x80   : > { %823 = vmatprep.mubr.f32.mxu0 %v271_v28  ;;  %835 = vmatprep.mubr.f32.mxu1 %v279_v29 }
  0x83   : > { %824 = vmatmul.mubr.f32.gmra.mrb[2].mxu0 %v272_v30  ;;  %836 = vmatmul.mubr.f32.gmra.mrb[2].mxu1 %v280_v31 }
  0x84   : > { %826 = vmatprep.mubr.f32.mxu0 %v273_v32  ;;  %838 = vmatprep.mubr.f32.mxu1 %v281_v33 }
  0x87   : > { %827 = vmatmul.mubr.f32.gmra.mrb[4].mxu0 %v274_v34  ;;  %839 = vmatmul.mubr.f32.gmra.mrb[4].mxu1 %v282_v35 }
  0x88   : > { %829 = vmatprep.mubr.f32.mxu0 %v275_v36  ;;  %841 = vmatprep.mubr.f32.mxu1 %v283_v37 }
  0x8b   : > { %830 = vmatmul.mubr.f32.gmra.mrb[6].mxu0 %v276_v38  ;;  %842 = vmatmul.mubr.f32.gmra.mrb[6].mxu1 %v284_v39 }
 0x152   : > { %v822_v40 = vpop.f32.mrb[0].mxu0  ;;  %v1369_v41 = vpop.f32.mrb[0].mxu1 }
 0x153   : > { %v520_v42 = vmul.f32 %v822_v40, %v822_v40  ;;  %560 = vst [vmem:[%s1373_s20 + $0x8] sm:$0xff] %v822_v40  ;;  %v368_v43 = vpop.f32.mrb[1].mxu0  ;;  %568 = vst [vmem:[%s1373_s20 + $0x48] sm:$0xff] %v1369_v41  ;;  %v1378_v44 = vpop.f32.mrb[1].mxu1 }
 0x154   : > { %v498_v45 = vadd.f32 %v822_v40, %v368_v43  ;;  %v519_v46 = vmul.f32 %v368_v43, %v368_v43  ;;  %559 = vst [vmem:[%s1373_s20] sm:$0xff] %v368_v43  ;;  %567 = vst [vmem:[%s1373_s20 + $0x40] sm:$0xff] %v1378_v44 }
 0x156   : > { %v535_v47 = vadd.f32 %v520_v42, %v519_v46  ;;  %v825_v48 = vpop.f32.mrb[2].mxu0  ;;  %v1383_v49 = vpop.f32.mrb[2].mxu1 }
 0x157   : > { %562 = vst [vmem:[%s1373_s20 + $0x18] sm:$0xff] %v825_v48  ;;  %v378_v50 = vpop.f32.mrb[3].mxu0  ;;  %570 = vst [vmem:[%s1373_s20 + $0x58] sm:$0xff] %v1383_v49  ;;  %v1388_v51 = vpop.f32.mrb[3].mxu1  ;;  %v522_v54 = vmul.f32 %v825_v48, %v825_v48 }
 0x158   : > { %v499_v52 = vadd.f32 %v498_v45, %v378_v50  ;;  %v521_v53 = vmul.f32 %v378_v50, %v378_v50  ;;  %561 = vst [vmem:[%s1373_s20 + $0x10] sm:$0xff] %v378_v50  ;;  %569 = vst [vmem:[%s1373_s20 + $0x50] sm:$0xff] %v1388_v51 }
 0x15a   : > { %v536_v55 = vadd.f32 %v535_v47, %v521_v53  ;;  %v828_v56 = vpop.f32.mrb[4].mxu0  ;;  %v500_v57 = vadd.f32 %v825_v48, %v499_v52  ;;  %v1393_v58 = vpop.f32.mrb[4].mxu1 }
 0x15b   : > { %564 = vst [vmem:[%s1373_s20 + $0x28] sm:$0xff] %v828_v56  ;;  %v388_v59 = vpop.f32.mrb[5].mxu0  ;;  %572 = vst [vmem:[%s1373_s20 + $0x68] sm:$0xff] %v1393_v58  ;;  %v1400_v60 = vpop.f32.mrb[5].mxu1  ;;  %v524_v0 = vmul.f32 %v828_v56, %v828_v56 }
 0x15c   : > { %v501_v61 = vadd.f32 %v500_v57, %v388_v59  ;;  %v523_v62 = vmul.f32 %v388_v59, %v388_v59  ;;  %v537_v63 = vadd.f32 %v536_v55, %v522_v54  ;;  %563 = vst [vmem:[%s1373_s20 + $0x20] sm:$0xff] %v388_v59  ;;  %571 = vst [vmem:[%s1373_s20 + $0x60] sm:$0xff] %v1400_v60 }
 0x15e   : > { %v538_v1 = vadd.f32 %v537_v63, %v523_v62  ;;  %v831_v2 = vpop.f32.mrb[6].mxu0  ;;  %v502_v3 = vadd.f32 %v828_v56, %v501_v61  ;;  %v1412_v4 = vpop.f32.mrb[6].mxu1 }
 0x15f   : > { %566 = vst [vmem:[%s1373_s20 + $0x38] sm:$0xff] %v831_v2  ;;  %v398_v5 = vpop.f32.mrb[7].mxu0  ;;  %574 = vst [vmem:[%s1373_s20 + $0x78] sm:$0xff] %v1412_v4  ;;  %v438_v6 = vpop.f32.mrb[7].mxu1 }
 0x160   : > { %v503_v7 = vadd.f32 %v502_v3, %v398_v5  ;;  %v525_v8 = vmul.f32 %v398_v5, %v398_v5  ;;  %v539_v9 = vadd.f32 %v538_v1, %v524_v0  ;;  %565 = vst [vmem:[%s1373_s20 + $0x30] sm:$0xff] %v398_v5  ;;  %573 = vst [vmem:[%s1373_s20 + $0x70] sm:$0xff] %v438_v6 }
 0x161   : > { %1045 = shalt.err (!%p1042_p5)
}
 0x162   : > { %s1046_s4 = scalar_lea.hbm %s1408_s9, 2048  ;;  %s1050_s7 = scalar_lea.hbm %s1519_s2, 8192 }
 0x163   : > { %p1047_p9 = scmp.ne.s32.totalorder %s1408_s9, %s1046_s4  ;;  %p1051_p3 = scmp.lt.u32.totalorder %s1408_s9, %s1519_s2 }
 0x164   : > { %p1052_p7 = scmp.lt.u32.totalorder %s1050_s7, %s1046_s4  ;;  %p1054_p4 = scmp.lt.u32.totalorder %s1046_s4, %s1408_s9 }
 0x165   : > { %p1048_p1 = pnand %p1047_p9, %p1278_p11 }
 0x166   : > { %p1053_p13 = por %p1052_p7, %p1051_p3 }
 0x167   : > { %p1049_p2 = pneg %p1048_p1 }
 0x168   : > { %p1055_p6 = por %p1054_p4, %p1053_p13 }
 0x16a   : > { %p1056_p8 = pnand %p1055_p6, %p1049_p2 }
 0x16c   : > { %1059 = shalt.err (!%p1056_p8)
}
 0x16d   : > { %s1157_s22 = smov 128   ;;  %s1158_s10 = smov 8   ;;  %v526_v10 = vmul.f32 %v831_v2, %v831_v2  ;;  %v504_v11 = vadd.f32 %v831_v2, %v503_v7  ;;  %v540_v12 = vadd.f32 %v539_v9, %v525_v8  ;;  %v527_v13 = vmul.f32 %v1378_v44, %v1378_v44 }
 0x16e   : > { %898 = dma.vmem_to_hbm [thread:$0]  (%p1278_p11), %s1410_s24, 2048, %s1408_s9, %s576_s18, %s1157_s22, %s1157_s22, %s1158_s10   ;;  %v528_v16 = vmul.f32 %v1369_v41, %v1369_v41  ;;  %v529_v19 = vmul.f32 %v1388_v51, %v1388_v51  ;;  %v530_v22 = vmul.f32 %v1383_v49, %v1383_v49  ;;  %v531_v25 = vmul.f32 %v1400_v60, %v1400_v60 }
 0x16f   : > { %v541_v14 = vadd.f32 %v540_v12, %v526_v10  ;;  %v505_v15 = vadd.f32 %v504_v11, %v1378_v44  ;;  %v532_v28 = vmul.f32 %v1393_v58, %v1393_v58  ;;  %v533_v31 = vmul.f32 %v438_v6, %v438_v6  ;;  %s746_s24 = sshll.u32 %s1337_s30, 1  ;;  %s751_s11 = sshll.u32 %s1142_s15, 5 }
 0x170   : > { %v534_v34 = vmul.f32 %v1412_v4, %v1412_v4  ;;  %s229_s9 = scalar_lea.vmem [#allocation9], %s746_s24  ;;  %vm556_vm0 = vcmask 1040384   ;;  %s1469_s26 = scalar_lea.hbm %s1520_s3, %s751_s11 }
 0x171   : > { %v542_v17 = vadd.f32 %v541_v14, %v527_v13  ;;  %v506_v18 = vadd.f32 %v1369_v41, %v505_v15  ;;  %s610_s18 = sshll.u32 %s229_s9, 4  ;;  %s581_s21 = scalar_lea.sflag [#allocation10], %s1337_s30  ;;  %s1471_s18 = int_to_ptr.vmem [resolvable:$true] %s610_s18 }
 0x172   : > { %s1060_s4 = scalar_lea.vmem %s1471_s18, 32  ;;  %s1159_s15 = smov [#allocation9]  }
 0x173   : > { %v507_v20 = vadd.f32 %v506_v18, %v1388_v51  ;;  %v543_v21 = vadd.f32 %v542_v17, %v528_v16  ;;  %p1061_p12 = scmp.ne.s32.totalorder %s1471_s18, %s1060_s4  ;;  %s1064_s6 = sshll.u32 %s1159_s15, 4  ;;  %s1065_s6 = int_to_ptr.vmem [resolvable:$false] %s1064_s6 }
 0x174   : > { %s1066_s29 = scalar_lea.vmem %s1065_s6, 64  ;;  %p1067_p5 = scmp.lt.s32.totalorder %s1471_s18, %s1065_s6 }
 0x175   : > { %v544_v23 = vadd.f32 %v543_v21, %v529_v19  ;;  %v508_v24 = vadd.f32 %v1383_v49, %v507_v20  ;;  %p1062_p10 = pnand %p1061_p12, %p1278_p11  ;;  %p1068_p9 = scmp.lt.s32.totalorder %s1066_s29, %s1060_s4 }
 0x177   : > { %v509_v26 = vadd.f32 %v508_v24, %v1400_v60  ;;  %v545_v27 = vadd.f32 %v544_v23, %v530_v22  ;;  %p1063_p0 = pneg %p1062_p10  ;;  %p1069_p1 = por %p1068_p9, %p1067_p5 }
 0x179   : > { %v546_v29 = vadd.f32 %v545_v27, %v531_v25  ;;  %v510_v30 = vadd.f32 %v1393_v58, %v509_v26  ;;  %p1070_p2 = pnand %p1069_p1, %p1063_p0 }
 0x17b   : > { %v511_v32 = vadd.f32 %v510_v30, %v438_v6  ;;  %v547_v33 = vadd.f32 %v546_v29, %v532_v28 }
 0x17d   : > { %v512_v35 = vadd.f32 %v1412_v4, %v511_v32  ;;  %v548_v36 = vadd.f32 %v547_v33, %v533_v31 }
 0x17f   : > { %v513_v37 = vrot.slane %v512_v35, 4  ;;  %v549_v38 = vadd.f32 %v548_v36, %v534_v34 }
 0x181   : > { %v514_v39 = vadd.f32 %v513_v37, %v512_v35  ;;  %v550_v40 = vrot.slane %v549_v38, 4 }
 0x183   : > { %v515_v41 = vrot.slane %v514_v39, 2  ;;  %v551_v42 = vadd.f32 %v550_v40, %v549_v38 }
 0x185   : > { %v516_v43 = vadd.f32 %v515_v41, %v514_v39  ;;  %v552_v44 = vrot.slane %v551_v42, 2 }
 0x187   : > { %v517_v45 = vrot.slane %v516_v43, 1  ;;  %v553_v46 = vadd.f32 %v552_v44, %v551_v42 }
 0x189   : > { %v554_v47 = vrot.slane %v553_v46, 1  ;;  %v518_v48 = vadd.f32 %v517_v45, %v516_v43 }
 0x18b   : > { %v555_v49 = vadd.f32 %v554_v47, %v553_v46 }
 0x18d   : > { %v557_v50 = vsel %vm556_vm0, %v518_v48, %v555_v49 }
 0x18e   : > { %558 = vst [vmem:[%s229_s9] sm:$0x3] %v557_v50 }
 0x18f   : > { %1073 = shalt.err (!%p1070_p2)
}
 0x190   : > { %s1074_s30 = scalar_lea.hbm %s1469_s26, 32  ;;  %s1078_s20 = scalar_lea.hbm %s1520_s3, 128 }
 0x191   : > { %p1075_p3 = scmp.ne.s32.totalorder %s1469_s26, %s1074_s30  ;;  %p1079_p4 = scmp.lt.u32.totalorder %s1469_s26, %s1520_s3 }
 0x192   : > { %p1080_p6 = scmp.lt.u32.totalorder %s1078_s20, %s1074_s30  ;;  %p1082_p12 = scmp.lt.u32.totalorder %s1074_s30, %s1469_s26 }
 0x193   : > { %p1076_p7 = pnand %p1075_p3, %p1278_p11 }
 0x194   : > { %p1081_p8 = por %p1080_p6, %p1079_p4 }
 0x195   : > { %p1077_p13 = pneg %p1076_p7 }
 0x196   : > { %p1083_p10 = por %p1082_p12, %p1081_p8 }
 0x198   : > { %p1084_p0 = pnand %p1083_p10, %p1077_p13 }
 0x19a   : > { %1087 = shalt.err (!%p1084_p0)
}
 0x19b   : > { %899 = dma.vmem_to_hbm [thread:$0]  (%p1278_p11), %s1471_s18, 32, %s1469_s26, %s581_s21  }
 0x19c PF: > { %p920_p5 = scmp.ge.s32.totalorder %s1150_s17, 2  ;;  %s622_s24 = sand.u32 1, %s1130_s12  }
 0x19d   : > { %p1538_p9 = scmp.ne.s32.totalorder %s1528_s23, 0  ;;  %s623_s11 = scalar_lea.sflag [#allocation5], %s622_s24 }
 0x19f   : > { %p911_p1 = pnand %p920_p5, %p1538_p9 }
 0x1a1   : > { %1121 = dma.done.wait (!%p911_p1), %s623_s11, 2048  }
 0x1a2   : > { %1123 = vsyncadd (!%p911_p1), %s623_s11, 4294965248  ;;  %s632_s9 = scalar_lea.sflag [#allocation10], %s622_s24 }
 0x1a3   : > { %1125 = dma.done.wait (!%p911_p1), %s632_s9, 32  }
 0x1a4   : > { %1127 = vsyncadd (!%p911_p1), %s632_s9, 4294967264  ;;  %s24_s17 = sadd.s32 1, %s1150_s17   ;;  %s1539_s12 = smov %s1134_s13 }
 0x1a5   : > { %p21_p2 = scmp.ge.s32.totalorder %s24_s17, 6   ;;  %s1540_s13 = smov %s1138_s14 }
 0x1a6   : > { %s1541_s14 = smov %s1287_s5  ;;  %s1542_s15 = smov %s1146_s16 }
 0x1a7   : > { %s1543_s16 = smov %s1545_s28  ;;  %23 = sbr.rel (!%p21_p2) target bundleno = 9 (0x9), region = 103 }
 0x1ae   :  { %637 = vsyncpa [#allocation4], 1 }
 0x1af   :  { %639 = vsyncpa [#allocation4 + $0x1], 1 }
 0x1b0   :  { %640 = vsyncpa [#allocation7], 1 }
 0x1b1   :  { %641 = vsyncpa [#allocation5], 1 }
 0x1b2   :  { %643 = vsyncpa [#allocation5 + $0x1], 1 }
 0x1b3   :  { %644 = vsyncpa [#allocation10], 1 }
 0x1b4   :  { %646 = vsyncpa [#allocation10 + $0x1], 1 }

</bundles_post_ra>
